<compile_context>
chip_gen: v7x
topology: tpu7x:2x2x1
jax: 0.10.0
libtpu: 0.0.40
codegen_flags: <defaults>
</compile_context>

<pallas_src>
import functools

import jax
import jax.numpy as jnp
from jax.experimental import pallas as pl
from jax.experimental.pallas import tpu as pltpu

D_IN = 32
D_HID = 64
D_HID_PAD = 128      # hidden padded to one full lane width (layout hygiene)
N_CLASSES = 10
N_PAD = 16           # class axis padded to 16 -> 8x fewer output bytes than 128
NEG_INF = -1e30      # padded-class bias so padded logits exp to exactly 0


def classifier_kernel(x_ref, w1_ref, b1_ref, w2_ref, b2_ref, probs_ref):
    # ---- hidden layer: Linear (f32 MXU, f32 acc) + bias + ReLU ---------------
    h = jnp.dot(x_ref[...], w1_ref[...], preferred_element_type=jnp.float32)
    h = jnp.maximum(h + b1_ref[...], 0.0)

    # ---- output layer: Linear into the 16-wide padded class axis -------------
    logits = jnp.dot(h, w2_ref[...], preferred_element_type=jnp.float32) + b2_ref[...]

    # ---- numerically stable softmax; padded classes carry -1e30 bias ---------
    m = jnp.max(logits, axis=-1, keepdims=True)
    e = jnp.exp(logits - m)
    denom = jnp.sum(e, axis=-1, keepdims=True)
    # Exact reciprocal (EUP has plenty of slack); rows sum to 1 tightly.
    probs_ref[...] = (e * pl.reciprocal(denom, approx=False)).astype(probs_ref.dtype)


def _round_up(n, m):
    return (n + m - 1) // m * m


@functools.partial(jax.jit, static_argnames=("tb_max", "min_grid"))
def classifier_forward(x, w1, b1, w2, b2, *, tb_max=8192, min_grid=8):
    """Forward pass matching Classifier.forward for 2-D (B, D_IN) inputs."""
    B = x.shape[0]
    B_pad = _round_up(B, 8)          # sublane-legal batch (pad rows are sliced off)

    # Tile selection: >= min_grid grid steps for DMA overlap (and >= 2 so v7x
    # megacore actually uses both TensorCores) once the batch is non-trivial;
    # cap TB so double-buffered x/out tiles stay ~2 MiB on every generation.
    if B_pad <= min_grid * 8:
        TB = B_pad                   # tiny batch: single step, overhead moot
    else:
        TB = min(tb_max, _round_up(pl.cdiv(B_pad, min_grid), 8))
    grid = (pl.cdiv(B_pad, TB),)

    # Host-side packing (all fused under this jit; weights are a few KiB).
    xf = x.astype(jnp.float32)
    if B_pad != B:
        xf = jnp.pad(xf, ((0, B_pad - B), (0, 0)))
    w1p = jnp.zeros((D_IN, D_HID_PAD), jnp.float32).at[:, :D_HID].set(
        w1.astype(jnp.float32))
    b1p = jnp.zeros((1, D_HID_PAD), jnp.float32).at[:, :D_HID].set(
        b1.reshape(1, D_HID).astype(jnp.float32))
    w2p = jnp.zeros((D_HID_PAD, N_PAD), jnp.float32).at[:D_HID, :N_CLASSES].set(
        w2.astype(jnp.float32))
    b2p = jnp.full((1, N_PAD), NEG_INF, jnp.float32).at[:, :N_CLASSES].set(
        b2.reshape(1, N_CLASSES).astype(jnp.float32))

    cost = pl.CostEstimate(
        flops=2 * B_pad * (D_IN * D_HID_PAD + D_HID_PAD * N_PAD),
        transcendentals=B_pad * N_PAD,
        bytes_accessed=4 * (xf.size + w1p.size + b1p.size + w2p.size + b2p.size
                            + B_pad * N_PAD),
    )

    out = pl.pallas_call(
        classifier_kernel,
        out_shape=jax.ShapeDtypeStruct((B_pad, N_PAD), jnp.float32),
        grid=grid,
        in_specs=[
            pl.BlockSpec((TB, D_IN), lambda i: (i, 0)),         # batch-tiled x
            pl.BlockSpec((D_IN, D_HID_PAD), lambda i: (0, 0)),  # resident W1 (padded)
            pl.BlockSpec((1, D_HID_PAD), lambda i: (0, 0)),     # resident b1 (padded)
            pl.BlockSpec((D_HID_PAD, N_PAD), lambda i: (0, 0)), # resident W2 (padded)
            pl.BlockSpec((1, N_PAD), lambda i: (0, 0)),         # resident b2 (padded)
        ],
        out_specs=pl.BlockSpec((TB, N_PAD), lambda i: (i, 0)),  # narrow f32 output
        compiler_params=pltpu.CompilerParams(
            dimension_semantics=("parallel",),
            vmem_limit_bytes=32 * 1024 * 1024),
        cost_estimate=cost,
    )(xf, w1p, b1p, w2p, b2p)

    # Fused under this jit: trim padded batch rows + padded classes, then mirror
    # torch's .squeeze() (drops the batch dim iff B == 1).
    probs = out[:B, :N_CLASSES]
    return jnp.squeeze(probs)


def init_params(key):
    # Deterministic init mimicking torch.nn.Linear default (uniform +-1/sqrt(fan_in)).
    k1, k2, k3, k4 = jax.random.split(key, 4)
    lim1 = 1.0 / jnp.sqrt(jnp.float32(D_IN))
    lim2 = 1.0 / jnp.sqrt(jnp.float32(D_HID))
    w1 = jax.random.uniform(k1, (D_IN, D_HID), jnp.float32, -lim1, lim1)
    b1 = jax.random.uniform(k2, (1, D_HID), jnp.float32, -lim1, lim1)
    w2 = jax.random.uniform(k3, (D_HID, N_CLASSES), jnp.float32, -lim2, lim2)
    b2 = jax.random.uniform(k4, (1, N_CLASSES), jnp.float32, -lim2, lim2)
    return w1, b1, w2, b2


if __name__ == "__main__":
    key = jax.random.PRNGKey(0)
    kx, kp = jax.random.split(key)
    B = 2
    x = jax.random.normal(kx, (B, D_IN), jnp.float32)
    w1, b1, w2, b2 = init_params(kp)

    probs = jax.block_until_ready(classifier_forward(x, w1, b1, w2, b2))

    # Pure-JAX f32 reference (matches the PyTorch f32 model semantics).
    h_ref = jnp.maximum(jnp.dot(x, w1) + b1, 0.0)
    logits_ref = jnp.dot(h_ref, w2) + b2
    probs_ref = jnp.squeeze(jax.nn.softmax(logits_ref, axis=-1))

    assert probs.shape == probs_ref.shape, (probs.shape, probs_ref.shape)
    assert jnp.allclose(probs, probs_ref, atol=2e-3), "mismatch vs reference"
    assert jnp.allclose(jnp.sum(probs, axis=-1), 1.0, atol=1e-3)

    # TODO(synk): the 3-D-input unsqueeze path in forward_logits only applies to
    # convolutional layer stacks and is not represented by this MLP instantiation.
    print("KERNEL_OK")
</pallas_src>

<mosaic_0001>
module attributes {stable_mosaic.version = 11 : i64} {
  func.func @classifier_kernel(%arg0: i32, %arg1: memref<8x32xf32, #tpu.memory_space<vmem>>, %arg2: memref<32x128xf32, #tpu.memory_space<vmem>>, %arg3: memref<1x128xf32, #tpu.memory_space<vmem>>, %arg4: memref<128x16xf32, #tpu.memory_space<vmem>>, %arg5: memref<1x16xf32, #tpu.memory_space<vmem>>, %arg6: memref<8x16xf32, #tpu.memory_space<vmem>>) attributes {dimension_semantics = [#tpu.dimension_semantics<parallel>], iteration_bounds = array<i64: 1>, scalar_prefetch = 0 : i64, scratch_operands = 0 : i64, tpu.core_type = #tpu.core_type<tc>, window_params = [{transform_indices = @transform_0, window_bounds = array<i64: 8, 32>}, {pipeline_mode = #tpu.pipeline_mode<synchronous>, transform_indices = @transform_1, window_bounds = array<i64: 32, 128>}, {pipeline_mode = #tpu.pipeline_mode<synchronous>, transform_indices = @transform_2, window_bounds = array<i64: 1, 128>}, {pipeline_mode = #tpu.pipeline_mode<synchronous>, transform_indices = @transform_3, window_bounds = array<i64: 128, 16>}, {pipeline_mode = #tpu.pipeline_mode<synchronous>, transform_indices = @transform_4, window_bounds = array<i64: 1, 16>}, {transform_indices = @transform_5, window_bounds = array<i64: 8, 16>}]} {
    %c0 = arith.constant 0 : index
    %c0_0 = arith.constant 0 : index
    %0 = vector.load %arg1[%c0, %c0_0] : memref<8x32xf32, #tpu.memory_space<vmem>>, vector<8x32xf32>
    %c0_1 = arith.constant 0 : index
    %c0_2 = arith.constant 0 : index
    %1 = vector.load %arg2[%c0_1, %c0_2] : memref<32x128xf32, #tpu.memory_space<vmem>>, vector<32x128xf32>
    %cst = arith.constant dense<0.000000e+00> : vector<8x128xf32>
    %2 = tpu.matmul %0, %1, %cst {dimension_numbers = #tpu.dot_dimension_numbers<[1], [0], [0], [1], [0, 0, 1, 1], [], []>} : vector<8x32xf32>, vector<32x128xf32>, vector<8x128xf32> -> vector<8x128xf32>
    %c0_3 = arith.constant 0 : index
    %c0_4 = arith.constant 0 : index
    %3 = vector.load %arg3[%c0_3, %c0_4] : memref<1x128xf32, #tpu.memory_space<vmem>>, vector<1x128xf32>
    %4 = vector.broadcast %3 : vector<1x128xf32> to vector<8x128xf32>
    %5 = arith.addf %2, %4 : vector<8x128xf32>
    %cst_5 = arith.constant 0.000000e+00 : f32
    %6 = vector.broadcast %cst_5 : f32 to vector<8x128xf32>
    %7 = arith.maximumf %5, %6 : vector<8x128xf32>
    %c0_6 = arith.constant 0 : index
    %c0_7 = arith.constant 0 : index
    %8 = vector.load %arg4[%c0_6, %c0_7] : memref<128x16xf32, #tpu.memory_space<vmem>>, vector<128x16xf32>
    %cst_8 = arith.constant dense<0.000000e+00> : vector<8x16xf32>
    %9 = tpu.matmul %7, %8, %cst_8 {dimension_numbers = #tpu.dot_dimension_numbers<[1], [0], [0], [1], [0, 0, 1, 1], [], []>} : vector<8x128xf32>, vector<128x16xf32>, vector<8x16xf32> -> vector<8x16xf32>
    %c0_9 = arith.constant 0 : index
    %c0_10 = arith.constant 0 : index
    %10 = vector.load %arg5[%c0_9, %c0_10] : memref<1x16xf32, #tpu.memory_space<vmem>>, vector<1x16xf32>
    %11 = vector.broadcast %10 : vector<1x16xf32> to vector<8x16xf32>
    %12 = arith.addf %9, %11 : vector<8x16xf32>
    %cst_11 = arith.constant dense<0xFF800000> : vector<8xf32>
    %13 = vector.multi_reduction <maximumf>, %12, %cst_11 [1] : vector<8x16xf32> to vector<8xf32>
    %14 = vector.shape_cast %13 : vector<8xf32> to vector<8x1xf32>
    %15 = vector.broadcast %14 : vector<8x1xf32> to vector<8x16xf32>
    %16 = arith.subf %12, %15 : vector<8x16xf32>
    %17 = math.exp %16 : vector<8x16xf32>
    %cst_12 = arith.constant dense<0.000000e+00> : vector<8xf32>
    %18 = vector.multi_reduction <add>, %17, %cst_12 [1] : vector<8x16xf32> to vector<8xf32>
    %19 = vector.shape_cast %18 : vector<8xf32> to vector<8x1xf32>
    %20 = tpu.reciprocal %19 : vector<8x1xf32> -> vector<8x1xf32>
    %21 = vector.broadcast %20 : vector<8x1xf32> to vector<8x16xf32>
    %22 = arith.mulf %17, %21 : vector<8x16xf32>
    %c0_13 = arith.constant 0 : index
    %c0_14 = arith.constant 0 : index
    %23 = vector.load %arg6[%c0_13, %c0_14] : memref<8x16xf32, #tpu.memory_space<vmem>>, vector<8x16xf32>
    tpu.vector_store %arg6[%c0_13, %c0_14], %22 {strides = array<i32>} : memref<8x16xf32, #tpu.memory_space<vmem>>, vector<8x16xf32>,
    return
  }
  func.func @transform_0(%arg0: i32) -> (i32, i32) {
    %c0_i32 = arith.constant 0 : i32
    %c0_i32_0 = arith.constant 0 : i32
    return %arg0, %c0_i32 : i32, i32
  }
  func.func @transform_1(%arg0: i32) -> (i32, i32) {
    %c0_i32 = arith.constant 0 : i32
    %c0_i32_0 = arith.constant 0 : i32
    %c0_i32_1 = arith.constant 0 : i32
    return %c0_i32, %c0_i32_0 : i32, i32
  }
  func.func @transform_2(%arg0: i32) -> (i32, i32) {
    %c0_i32 = arith.constant 0 : i32
    %c0_i32_0 = arith.constant 0 : i32
    %c0_i32_1 = arith.constant 0 : i32
    return %c0_i32, %c0_i32_0 : i32, i32
  }
  func.func @transform_3(%arg0: i32) -> (i32, i32) {
    %c0_i32 = arith.constant 0 : i32
    %c0_i32_0 = arith.constant 0 : i32
    %c0_i32_1 = arith.constant 0 : i32
    return %c0_i32, %c0_i32_0 : i32, i32
  }
  func.func @transform_4(%arg0: i32) -> (i32, i32) {
    %c0_i32 = arith.constant 0 : i32
    %c0_i32_0 = arith.constant 0 : i32
    %c0_i32_1 = arith.constant 0 : i32
    return %c0_i32, %c0_i32_0 : i32, i32
  }
  func.func @transform_5(%arg0: i32) -> (i32, i32) {
    %c0_i32 = arith.constant 0 : i32
    %c0_i32_0 = arith.constant 0 : i32
    return %arg0, %c0_i32 : i32, i32
  }
}

</mosaic_0001>

<bundles_post_ra>
// kernel: classifier_forward.1
= control target key start
LH: loop header
LB: loop body
LE: loop exit
PB: predicated region body
PF: predicated region fallthrough
CT: control target
= control target key end

     0   :  { %v325_v0 = vmov 0.0|0.0   ;;  %vm326_vm0 = vmmov 0   ;;  %v327_v4 = vmov 0.0   ;;  %vm32_vm1 = vcmask 261120   ;;  %s433_s1 = inlined_call_operand.vmem [shape: f32[32,128], index: 1, kind: input, shape index: {}]   ;;  %s434_s3 = inlined_call_operand.vmem [shape: f32[128,16], index: 3, kind: input, shape index: {}]   ;;  %s435_s0 = inlined_call_operand.vmem [shape: f32[8,32], index: 0, kind: input, shape index: {}]   ;;  %s436_s2 = inlined_call_operand.vmem [shape: f32[1,128], index: 2, kind: input, shape index: {}]   ;;  %s437_s4 = inlined_call_operand.vmem [shape: f32[1,16], index: 4, kind: input, shape index: {}]   ;;  %s438_s5 = inlined_call_operand.vmem [shape: f32[8,16], index: 5, kind: output, shape index: {}]  }
   0x1   :  { %288 = vmatprep.subr.bf16.mxu0 %v325_v0  ;;  %v21_v1 = vld [vmem:[%s433_s1] sm:$0xff]  ;;  %v22_v2 = vld [vmem:[%s433_s1 + $0x8] sm:$0xff]  ;;  %v23_v3 = vld [vmem:[%s433_s1 + $0x10] sm:$0xff]  ;;  %250 = vmatprep.mubr.msk.f32.mxu0 %vm326_vm0, %v327_v4  ;;  %vm200_vm2 = vcmask 130048  }
   0x2   :  { %v289_v5 = vpack.c.bf16 %v22_v2, %v21_v1  ;;  %v24_v6 = vld [vmem:[%s433_s1 + $0x18] sm:$0xff]  ;;  %294 = vmatprep.subr.bf16.mxu1 %v325_v0  ;;  %v107_v7 = vld [vmem:[%s434_s3] sm:$0xff]  ;;  %285 = vmatprep.mubr.msk.f32.mxu1 %vm326_vm0, %v327_v4  ;;  %v108_v8 = vld [vmem:[%s434_s3 + $0x8] sm:$0xff] }
   0x3   :  { %v109_v9 = vld [vmem:[%s434_s3 + $0x10] sm:$0xff]  ;;  %v110_v10 = vld [vmem:[%s434_s3 + $0x18] sm:$0xff]  ;;  %v292_v11 = vpack.c.bf16 %v24_v6, %v23_v3  ;;  %v295_v12 = vpack.c.bf16 %v108_v8, %v107_v7  ;;  %v111_v14 = vld [vmem:[%s434_s3 + $0x20] sm:$0xff] }
   0x4   :  { %290 = vmatpush3.bf16.msra.mxu0 %v289_v5  ;;  %v298_v13 = vpack.c.bf16 %v110_v10, %v109_v9  ;;  %v112_v15 = vld [vmem:[%s434_s3 + $0x28] sm:$0xff]  ;;  %v20_v16 = vld [vmem:[%s435_s0] sm:$0xff]  ;;  %v113_v18 = vld [vmem:[%s434_s3 + $0x30] sm:$0xff] }
   0x5   :  { %291 = vmatprep.subr.bf16.mxu0 %v325_v0  ;;  %296 = vmatpush3.bf16.msra.mxu1 %v295_v12  ;;  %v301_v17 = vpack.c.bf16 %v112_v15, %v111_v14  ;;  %v114_v19 = vld [vmem:[%s434_s3 + $0x38] sm:$0xff]  ;;  %v115_v21 = vld [vmem:[%s434_s3 + $0x40] sm:$0xff]  ;;  %v116_v22 = vld [vmem:[%s434_s3 + $0x48] sm:$0xff] }
   0x6   :  { %297 = vmatprep.subr.bf16.mxu1 %v325_v0  ;;  %v304_v20 = vpack.c.bf16 %v114_v19, %v113_v18  ;;  %v307_v23 = vpack.c.bf16 %v116_v22, %v115_v21  ;;  %v117_v24 = vld [vmem:[%s434_s3 + $0x50] sm:$0xff]  ;;  %v118_v25 = vld [vmem:[%s434_s3 + $0x58] sm:$0xff]  ;;  %v119_v27 = vld [vmem:[%s434_s3 + $0x60] sm:$0xff] }
   0x7   :  { %v310_v26 = vpack.c.bf16 %v118_v25, %v117_v24  ;;  %v120_v28 = vld [vmem:[%s434_s3 + $0x68] sm:$0xff]  ;;  %v121_v30 = vld [vmem:[%s434_s3 + $0x70] sm:$0xff]  ;;  %v122_v31 = vld [vmem:[%s434_s3 + $0x78] sm:$0xff] }
   0x8   :  { %293 = vmatpush3.bf16.msra.mxu0 %v292_v11  ;;  %v313_v29 = vpack.c.bf16 %v120_v28, %v119_v27  ;;  %v316_v32 = vpack.c.bf16 %v122_v31, %v121_v30  ;;  %v217_v33 = vld [vmem:[%s436_s2] ss:$0 sm:$0xff] }
   0x9   :  { %299 = vmatpush3.bf16.msra.mxu1 %v298_v13  ;;  %v219_v38 = vld [vmem:[%s437_s4] ss:$0 sm:$0xff] }
   0xa   :  { %300 = vmatprep.subr.bf16.mxu1 %v325_v0 }
   0xb   :  { %251 = vmatmul.mubr.msk.f32.vlgmr.msra.gmra.mrb[0].mxu0 %vm32_vm1, %v20_v16 }
   0xd   :  { %302 = vmatpush3.bf16.msra.mxu1 %v301_v17 }
   0xe   :  { %303 = vmatprep.subr.bf16.mxu1 %v325_v0 }
  0x11   :  { %305 = vmatpush3.bf16.msra.mxu1 %v304_v20 }
  0x12   :  { %306 = vmatprep.subr.bf16.mxu1 %v325_v0 }
  0x15   :  { %308 = vmatpush3.bf16.msra.mxu1 %v307_v23 }
  0x16   :  { %309 = vmatprep.subr.bf16.mxu1 %v325_v0 }
  0x19   :  { %311 = vmatpush3.bf16.msra.mxu1 %v310_v26 }
  0x1a   :  { %312 = vmatprep.subr.bf16.mxu1 %v325_v0 }
  0x1d   :  { %314 = vmatpush3.bf16.msra.mxu1 %v313_v29 }
  0x1e   :  { %315 = vmatprep.subr.bf16.mxu1 %v325_v0 }
  0x21   :  { %317 = vmatpush3.bf16.msra.mxu1 %v316_v32 }
  0xde   :  { %v102_v34 = vpop.f32.mrb[0].mxu0 }
  0xdf   :  { %v103_v35 = vadd.f32 %v217_v33, %v102_v34  ;;  %v252_v36 = vpop.f32.mrb[1].mxu0 }
  0xe1   :  { %v106_v37 = vmax.f32 %v103_v35, 0.0 }
  0xe3   :  { %286 = vmatmul.mubr.f32.vlgmr.msra.gmra.mrb[0].mxu1 %v106_v37 }
 0x1b6   :  { %v196_v39 = vpop.f32.mrb[0].mxu1 }
 0x1b7   :  { %v197_v40 = vadd.f32 %v219_v38, %v196_v39  ;;  %v287_v41 = vpop.f32.mrb[1].mxu1 }
 0x1b9   :  { %v201_v42 = vsel %vm200_vm2, %v197_v40, -inf }
 0x1ba   :  { %202 = vmax.xlane.f32.xlu0 %v201_v42 }
 0x247   :  { %v203_v43 = vpop.xlane.xlu0 %202 }
 0x248   :  { %v204_v44 = vsub.f32 %v197_v40, %v203_v43 }
 0x24a   :  { %v205_v45 = vmul.f32 1.442695, %v204_v44 }
 0x24c   :  { %321 = vpow2.f32 %v205_v45 }
 0x256   :  { %v322_v46 = vpop.eup %321 }
 0x257   :  { %v207_v47 = vsel %vm200_vm2, %v322_v46, 0.0 }
 0x258   :  { %208 = vadd.xlane.f32.xlu0 %v207_v47 }
 0x2e5   :  { %v209_v48 = vpop.xlane.xlu0 %208 }
 0x2e6   :  { %323 = vrcp.f32 %v209_v48 }
 0x2f0   :  { %v324_v49 = vpop.eup %323 }
 0x2f1   :  { %v211_v50 = vmul.f32 %v324_v49, %v322_v46 }
 0x2f3   :  { %212 = vst.msk [vmem:[%s438_s5] sm:$0xff] %vm200_vm2, %v211_v50 }

</bundles_post_ra>
